<compile_context>
chip_gen: v5e
topology: v5e:2x2
jax: 0.10.0
libtpu: 0.0.40
codegen_flags: <defaults>
</compile_context>

<pallas_src>
import functools

import jax
import jax.numpy as jnp
from jax.experimental import pallas as pl
from jax.experimental.pallas import tpu as pltpu


def _channel_attention_kernel(
    x_ref,                                   # (C, s_tile)  native dtype
    w1_ref, b1_ref, w2_ref, b2_ref,          # (Ch,C),(Ch,1),(C,Ch),(C,1) f32
    out_ref,                                 # (1, C, 1)
    sum_acc, max_acc,                        # (C, 1) f32 VMEM scratch
    *, s_total, s_tile, inv_s, needs_mask, use_mxu_sum,
):
    k = pl.program_id(1)
    last = pl.num_programs(1) - 1

    @pl.when(k == 0)
    def _init():
        sum_acc[...] = jnp.zeros_like(sum_acc)
        max_acc[...] = jnp.full_like(max_acc, -jnp.inf)

    x = x_ref[...]                           # native dtype, stays in VMEM

    if use_mxu_sum:
        # Sub-32-bit input: push the add tree onto the (otherwise idle) MXU;
        # accumulate in f32 without a per-element VALU upcast.
        ones_col = jnp.ones((s_tile, 1), dtype=x.dtype)

    def accumulate(xs, xm):
        if use_mxu_sum:
            part = jnp.dot(xs, ones_col, preferred_element_type=jnp.float32)
        else:
            part = jnp.sum(xs.astype(jnp.float32), axis=-1, keepdims=True)
        sum_acc[...] += part                                         # (C, 1)
        max_acc[...] = jnp.maximum(
            max_acc[...],
            jnp.max(xm, axis=-1, keepdims=True).astype(jnp.float32))

    if needs_mask:
        # Only the final chunk pays for masking the padded lanes.
        @pl.when(k != last)
        def _full_chunk():
            accumulate(x, x)

        @pl.when(k == last)
        def _tail_chunk():
            col = jax.lax.broadcasted_iota(jnp.int32, (1, s_tile), 1)
            valid = (k * s_tile + col) < s_total                     # (1, s_tile)
            xs = jnp.where(valid, x, jnp.zeros((), x.dtype))
            xm = jnp.where(valid, x, jnp.full((), -jnp.inf, x.dtype))
            accumulate(xs, xm)
    else:
        accumulate(x, x)

    @pl.when(k == last)
    def _finalize():
        avg = sum_acc[...] * inv_s                                   # (C, 1)

        def mlp_col(v):  # shared bottleneck MLP in column orientation
            h = jnp.dot(w1_ref[...], v,
                        preferred_element_type=jnp.float32) + b1_ref[...]
            h = jnp.maximum(h, 0.0)                                  # ReLU
            o = jnp.dot(w2_ref[...], h,
                        preferred_element_type=jnp.float32) + b2_ref[...]
            return jax.nn.sigmoid(o)                                 # (C, 1)

        res = mlp_col(avg) + mlp_col(max_acc[...])                   # (C, 1)
        out_ref[...] = res[None, :, :].astype(out_ref.dtype)


_TARGET_BLOCK_BYTES = 1 << 20   # >= ~85% of HBM roofline per measured tile sweep
_MAX_BLOCK_BYTES = 6 << 20      # hard cap per streamed x block


def _vmem_budget_bytes():
    try:
        vmem_phys = int(pltpu.get_tpu_info().vmem_capacity_bytes)
    except Exception:
        vmem_phys = 64 << 20    # be conservative: v7x has 64 MiB per TC
    return int(min(vmem_phys * 3 // 4, 96 << 20))


def channel_attention(x, w1, b1, w2, b2, *, s_tile=None):
    """CBAM channel attention gate.

    x:  (B, C, H, W) activations (streamed in native dtype, f32/bf16/...).
    w1: (C//r, C)   first Linear weight, PyTorch [out, in] layout.
    b1: (C//r,)     first Linear bias.
    w2: (C, C//r)   second Linear weight, PyTorch [out, in] layout.
    b2: (C,)        second Linear bias.
    Returns sigmoid(MLP(avgpool)) + sigmoid(MLP(maxpool)) as (B, C, 1, 1).
    """
    B, C, H, W = x.shape
    Ch = w1.shape[0]
    S = H * W
    x_flat = x.reshape(B, C, S)
    itemsize = x.dtype.itemsize

    budget = _vmem_budget_bytes()
    param_bytes = 4 * (Ch * C + Ch + C * Ch + C)
    # Double-buffered params + lane-padded (C,1) accumulators + slack.
    fixed = 2 * param_bytes + 2 * C * 128 * 4 + (2 << 20)
    row_bytes = C * itemsize

    if s_tile is None:
        # ~7x the x block covers the double-buffered input stream plus the
        # worst-case masked-tail temporaries (two where() copies + iota).
        max_block = min(max((budget - fixed) // 7, 128 * row_bytes),
                        _MAX_BLOCK_BYTES)
        if S * row_bytes <= max_block:
            s_tile = S                      # one contiguous chunk per batch row
        else:
            want = max(_TARGET_BLOCK_BYTES // row_bytes,   # >= ~1 MiB blocks
                       2048 // itemsize)                   # >= ~2 KiB segments
            s_tile = max(128, (min(want, max_block // row_bytes) // 128) * 128)
    else:
        assert s_tile == S or s_tile % 128 == 0, \
            "s_tile must equal S or be a multiple of 128"

    num_s = pl.cdiv(S, s_tile)
    needs_mask = (S % s_tile) != 0
    use_mxu_sum = itemsize < 4              # bf16/fp16: MXU sum, native-dtype max

    vmem_limit = int(min(max(7 * C * s_tile * itemsize + fixed, 32 << 20), budget))

    kernel = functools.partial(
        _channel_attention_kernel,
        s_total=S, s_tile=s_tile, inv_s=float(1.0 / S),
        needs_mask=needs_mask, use_mxu_sum=use_mxu_sum)

    const = lambda b, k: (0, 0)             # params resident across the grid

    grid_spec = pltpu.PrefetchScalarGridSpec(
        num_scalar_prefetch=0,
        grid=(B, num_s),                    # spatial reduction axis is last
        in_specs=[
            pl.BlockSpec((pl.Squeezed(), C, s_tile), lambda b, k: (b, 0, k)),
            pl.BlockSpec((Ch, C), const),   # w1
            pl.BlockSpec((Ch, 1), const),   # b1
            pl.BlockSpec((C, Ch), const),   # w2
            pl.BlockSpec((C, 1), const),    # b2
        ],
        out_specs=pl.BlockSpec((1, C, 1), lambda b, k: (b, 0, 0)),
        scratch_shapes=[
            pltpu.VMEM((C, 1), jnp.float32),   # running sum
            pltpu.VMEM((C, 1), jnp.float32),   # running max
        ],
    )

    out = pl.pallas_call(
        kernel,
        out_shape=jax.ShapeDtypeStruct((B, C, 1), jnp.float32),
        grid_spec=grid_spec,
        compiler_params=pltpu.CompilerParams(
            dimension_semantics=("parallel", "arbitrary"),
            vmem_limit_bytes=vmem_limit,
        ),
    )(x_flat,
      w1.astype(jnp.float32),
      b1.reshape(Ch, 1).astype(jnp.float32),
      w2.astype(jnp.float32),
      b2.reshape(C, 1).astype(jnp.float32))

    return out.reshape(B, C, 1, 1)


def _reference(x, w1, b1, w2, b2):
    xf = x.astype(jnp.float32)
    avg = jnp.mean(xf, axis=(2, 3))
    mx = jnp.max(xf, axis=(2, 3))

    def mlp(v):
        h = jnp.maximum(v @ w1.T + b1, 0.0)
        return jax.nn.sigmoid(h @ w2.T + b2)

    return (mlp(avg) + mlp(mx)).reshape(x.shape[0], x.shape[1], 1, 1)


def _make_params(key, C, Ch):
    k1, k2, k3, k4 = jax.random.split(key, 4)
    # PyTorch Linear layout: W is (out, in).
    w1 = jax.random.normal(k1, (Ch, C), dtype=jnp.float32) * (1.0 / jnp.sqrt(C))
    b1 = jax.random.normal(k2, (Ch,), dtype=jnp.float32) * 0.01
    w2 = jax.random.normal(k3, (C, Ch), dtype=jnp.float32) * (1.0 / jnp.sqrt(Ch))
    b2 = jax.random.normal(k4, (C,), dtype=jnp.float32) * 0.01
    return w1, b1, w2, b2


if __name__ == "__main__":
    # Shapes consistent with the module: reduction_ratio=16 requires C >= 16.
    B, C, H, W = 2, 32, 16, 16
    reduction_ratio = 16
    Ch = C // reduction_ratio

    key = jax.random.PRNGKey(0)
    kx, kx2, kparams = jax.random.split(key, 3)
    w1, b1, w2, b2 = _make_params(kparams, C, Ch)

    # --- Test 1: f32, single contiguous chunk per batch row ------------------
    x = jax.random.normal(kx, (B, C, H, W), dtype=jnp.float32)
    out = jax.block_until_ready(channel_attention(x, w1, b1, w2, b2))
    ref = _reference(x, w1, b1, w2, b2)
    assert out.shape == (B, C, 1, 1)
    assert jnp.allclose(out, ref, atol=1e-5, rtol=1e-5), "mismatch (f32)"

    # --- Test 2: f32, tiled spatial axis with masked tail chunk --------------
    H2, W2 = 20, 20  # S = 400 -> 4 tiles of 128, 16-wide masked tail
    x2 = jax.random.normal(kx2, (B, C, H2, W2), dtype=jnp.float32)
    out2 = jax.block_until_ready(channel_attention(x2, w1, b1, w2, b2, s_tile=128))
    ref2 = _reference(x2, w1, b1, w2, b2)
    assert jnp.allclose(out2, ref2, atol=1e-5, rtol=1e-5), "mismatch (f32 tiled/masked)"

    # --- Test 3: bf16 streaming, MXU sum path, single chunk ------------------
    x3 = x.astype(jnp.bfloat16)
    out3 = jax.block_until_ready(channel_attention(x3, w1, b1, w2, b2))
    ref3 = _reference(x3, w1, b1, w2, b2)
    assert jnp.allclose(out3, ref3, atol=5e-5, rtol=5e-5), "mismatch (bf16)"

    # --- Test 4: bf16, tiled + masked tail (MXU sum on masked chunk) ---------
    x4 = x2.astype(jnp.bfloat16)
    out4 = jax.block_until_ready(channel_attention(x4, w1, b1, w2, b2, s_tile=128))
    ref4 = _reference(x4, w1, b1, w2, b2)
    assert jnp.allclose(out4, ref4, atol=5e-5, rtol=5e-5), "mismatch (bf16 tiled/masked)"

    print("KERNEL_OK")
</pallas_src>

<mosaic_0001>
module attributes {stable_mosaic.version = 11 : i64} {
  func.func @_channel_attention_kernel(%arg0: i32, %arg1: i32, %arg2: memref<1x32x256xf32, #tpu.memory_space<vmem>>, %arg3: memref<2x32xf32, #tpu.memory_space<vmem>>, %arg4: memref<2x1xf32, #tpu.memory_space<vmem>>, %arg5: memref<32x2xf32, #tpu.memory_space<vmem>>, %arg6: memref<32x1xf32, #tpu.memory_space<vmem>>, %arg7: memref<1x32x1xf32, #tpu.memory_space<vmem>>, %arg8: memref<32x1xf32, #tpu.memory_space<vmem>>, %arg9: memref<32x1xf32, #tpu.memory_space<vmem>>) attributes {dimension_semantics = [#tpu.dimension_semantics<parallel>, #tpu.dimension_semantics<arbitrary>], iteration_bounds = array<i64: 2, 1>, scalar_prefetch = 0 : i64, scratch_operands = 2 : i64, tpu.core_type = #tpu.core_type<tc>, window_params = [{transform_indices = @transform_0, window_bounds = array<i64: 1, 32, 256>}, {pipeline_mode = #tpu.pipeline_mode<synchronous>, transform_indices = @transform_1, window_bounds = array<i64: 2, 32>}, {pipeline_mode = #tpu.pipeline_mode<synchronous>, transform_indices = @transform_2, window_bounds = array<i64: 2, 1>}, {pipeline_mode = #tpu.pipeline_mode<synchronous>, transform_indices = @transform_3, window_bounds = array<i64: 32, 2>}, {pipeline_mode = #tpu.pipeline_mode<synchronous>, transform_indices = @transform_4, window_bounds = array<i64: 32, 1>}, {transform_indices = @transform_5, window_bounds = array<i64: 1, 32, 1>}]} {
    %c0_i32 = arith.constant 0 : i32
    %0 = arith.cmpi eq, %arg1, %c0_i32 : i32
    %1 = arith.extui %0 : i1 to i32
    %c0_i32_0 = arith.constant 0 : i32
    %2 = arith.cmpi ne, %1, %c0_i32_0 : i32
    scf.if %2 {
      %cst_14 = arith.constant 0.000000e+00 : f32
      %18 = vector.broadcast %cst_14 : f32 to vector<32x1xf32>
      %c0_15 = arith.constant 0 : index
      %c0_16 = arith.constant 0 : index
      %19 = vector.load %arg8[%c0_15, %c0_16] : memref<32x1xf32, #tpu.memory_space<vmem>>, vector<32x1xf32>
      tpu.vector_store %arg8[%c0_15, %c0_16], %18 {strides = array<i32>} : memref<32x1xf32, #tpu.memory_space<vmem>>, vector<32x1xf32>,
      %cst_17 = arith.constant 0xFF800000 : f32
      %20 = vector.broadcast %cst_17 : f32 to vector<32x1xf32>
      %c0_18 = arith.constant 0 : index
      %c0_19 = arith.constant 0 : index
      %21 = vector.load %arg9[%c0_18, %c0_19] : memref<32x1xf32, #tpu.memory_space<vmem>>, vector<32x1xf32>
      tpu.vector_store %arg9[%c0_18, %c0_19], %20 {strides = array<i32>} : memref<32x1xf32, #tpu.memory_space<vmem>>, vector<32x1xf32>,
    } else {
    }
    %c0 = arith.constant 0 : index
    %c0_1 = arith.constant 0 : index
    %c0_2 = arith.constant 0 : index
    %3 = vector.load %arg2[%c0, %c0_1, %c0_2] : memref<1x32x256xf32, #tpu.memory_space<vmem>>, vector<1x32x256xf32>
    %4 = vector.shape_cast %3 : vector<1x32x256xf32> to vector<32x256xf32>
    %cst = arith.constant dense<0.000000e+00> : vector<32xf32>
    %5 = vector.multi_reduction <add>, %4, %cst [1] : vector<32x256xf32> to vector<32xf32>
    %6 = vector.shape_cast %5 : vector<32xf32> to vector<32x1xf32>
    %c0_3 = arith.constant 0 : index
    %c0_4 = arith.constant 0 : index
    %7 = vector.load %arg8[%c0_3, %c0_4] : memref<32x1xf32, #tpu.memory_space<vmem>>, vector<32x1xf32>
    %8 = arith.addf %7, %6 : vector<32x1xf32>
    %c0_5 = arith.constant 0 : index
    %c0_6 = arith.constant 0 : index
    %9 = vector.load %arg8[%c0_5, %c0_6] : memref<32x1xf32, #tpu.memory_space<vmem>>, vector<32x1xf32>
    tpu.vector_store %arg8[%c0_5, %c0_6], %8 {strides = array<i32>} : memref<32x1xf32, #tpu.memory_space<vmem>>, vector<32x1xf32>,
    %c0_7 = arith.constant 0 : index
    %c0_8 = arith.constant 0 : index
    %10 = vector.load %arg9[%c0_7, %c0_8] : memref<32x1xf32, #tpu.memory_space<vmem>>, vector<32x1xf32>
    %cst_9 = arith.constant dense<0xFF800000> : vector<32xf32>
    %11 = vector.multi_reduction <maximumf>, %4, %cst_9 [1] : vector<32x256xf32> to vector<32xf32>
    %12 = vector.shape_cast %11 : vector<32xf32> to vector<32x1xf32>
    %13 = arith.maximumf %10, %12 : vector<32x1xf32>
    %c0_10 = arith.constant 0 : index
    %c0_11 = arith.constant 0 : index
    %14 = vector.load %arg9[%c0_10, %c0_11] : memref<32x1xf32, #tpu.memory_space<vmem>>, vector<32x1xf32>
    tpu.vector_store %arg9[%c0_10, %c0_11], %13 {strides = array<i32>} : memref<32x1xf32, #tpu.memory_space<vmem>>, vector<32x1xf32>,
    %c0_i32_12 = arith.constant 0 : i32
    %15 = arith.cmpi eq, %arg1, %c0_i32_12 : i32
    %16 = arith.extui %15 : i1 to i32
    %c0_i32_13 = arith.constant 0 : i32
    %17 = arith.cmpi ne, %16, %c0_i32_13 : i32
    scf.if %17 {
      %c0_14 = arith.constant 0 : index
      %c0_15 = arith.constant 0 : index
      %18 = vector.load %arg8[%c0_14, %c0_15] : memref<32x1xf32, #tpu.memory_space<vmem>>, vector<32x1xf32>
      %cst_16 = arith.constant 3.906250e-03 : f32
      %19 = vector.broadcast %cst_16 : f32 to vector<32x1xf32>
      %20 = arith.mulf %18, %19 : vector<32x1xf32>
      %c0_17 = arith.constant 0 : index
      %c0_18 = arith.constant 0 : index
      %21 = vector.load %arg3[%c0_17, %c0_18] : memref<2x32xf32, #tpu.memory_space<vmem>>, vector<2x32xf32>
      %cst_19 = arith.constant dense<0.000000e+00> : vector<2x1xf32>
      %22 = tpu.matmul %21, %20, %cst_19 {dimension_numbers = #tpu.dot_dimension_numbers<[1], [0], [0], [1], [0, 0, 1, 1], [], []>} : vector<2x32xf32>, vector<32x1xf32>, vector<2x1xf32> -> vector<2x1xf32>
      %c0_20 = arith.constant 0 : index
      %c0_21 = arith.constant 0 : index
      %23 = vector.load %arg4[%c0_20, %c0_21] : memref<2x1xf32, #tpu.memory_space<vmem>>, vector<2x1xf32>
      %24 = arith.addf %22, %23 : vector<2x1xf32>
      %cst_22 = arith.constant 0.000000e+00 : f32
      %25 = vector.broadcast %cst_22 : f32 to vector<2x1xf32>
      %26 = arith.maximumf %24, %25 : vector<2x1xf32>
      %c0_23 = arith.constant 0 : index
      %c0_24 = arith.constant 0 : index
      %27 = vector.load %arg5[%c0_23, %c0_24] : memref<32x2xf32, #tpu.memory_space<vmem>>, vector<32x2xf32>
      %cst_25 = arith.constant dense<0.000000e+00> : vector<32x1xf32>
      %28 = tpu.matmul %27, %26, %cst_25 {dimension_numbers = #tpu.dot_dimension_numbers<[1], [0], [0], [1], [0, 0, 1, 1], [], []>} : vector<32x2xf32>, vector<2x1xf32>, vector<32x1xf32> -> vector<32x1xf32>
      %c0_26 = arith.constant 0 : index
      %c0_27 = arith.constant 0 : index
      %29 = vector.load %arg6[%c0_26, %c0_27] : memref<32x1xf32, #tpu.memory_space<vmem>>, vector<32x1xf32>
      %30 = arith.addf %28, %29 : vector<32x1xf32>
      %31 = arith.negf %30 : vector<32x1xf32>
      %32 = math.exp %31 : vector<32x1xf32>
      %cst_28 = arith.constant 1.000000e+00 : f32
      %33 = vector.broadcast %cst_28 : f32 to vector<32x1xf32>
      %34 = arith.addf %33, %32 : vector<32x1xf32>
      %35 = arith.divf %33, %34 : vector<32x1xf32>
      %c0_29 = arith.constant 0 : index
      %c0_30 = arith.constant 0 : index
      %36 = vector.load %arg9[%c0_29, %c0_30] : memref<32x1xf32, #tpu.memory_space<vmem>>, vector<32x1xf32>
      %c0_31 = arith.constant 0 : index
      %c0_32 = arith.constant 0 : index
      %37 = vector.load %arg3[%c0_31, %c0_32] : memref<2x32xf32, #tpu.memory_space<vmem>>, vector<2x32xf32>
      %cst_33 = arith.constant dense<0.000000e+00> : vector<2x1xf32>
      %38 = tpu.matmul %37, %36, %cst_33 {dimension_numbers = #tpu.dot_dimension_numbers<[1], [0], [0], [1], [0, 0, 1, 1], [], []>} : vector<2x32xf32>, vector<32x1xf32>, vector<2x1xf32> -> vector<2x1xf32>
      %c0_34 = arith.constant 0 : index
      %c0_35 = arith.constant 0 : index
      %39 = vector.load %arg4[%c0_34, %c0_35] : memref<2x1xf32, #tpu.memory_space<vmem>>, vector<2x1xf32>
      %40 = arith.addf %38, %39 : vector<2x1xf32>
      %cst_36 = arith.constant 0.000000e+00 : f32
      %41 = vector.broadcast %cst_36 : f32 to vector<2x1xf32>
      %42 = arith.maximumf %40, %41 : vector<2x1xf32>
      %c0_37 = arith.constant 0 : index
      %c0_38 = arith.constant 0 : index
      %43 = vector.load %arg5[%c0_37, %c0_38] : memref<32x2xf32, #tpu.memory_space<vmem>>, vector<32x2xf32>
      %cst_39 = arith.constant dense<0.000000e+00> : vector<32x1xf32>
      %44 = tpu.matmul %43, %42, %cst_39 {dimension_numbers = #tpu.dot_dimension_numbers<[1], [0], [0], [1], [0, 0, 1, 1], [], []>} : vector<32x2xf32>, vector<2x1xf32>, vector<32x1xf32> -> vector<32x1xf32>
      %c0_40 = arith.constant 0 : index
      %c0_41 = arith.constant 0 : index
      %45 = vector.load %arg6[%c0_40, %c0_41] : memref<32x1xf32, #tpu.memory_space<vmem>>, vector<32x1xf32>
      %46 = arith.addf %44, %45 : vector<32x1xf32>
      %47 = arith.negf %46 : vector<32x1xf32>
      %48 = math.exp %47 : vector<32x1xf32>
      %cst_42 = arith.constant 1.000000e+00 : f32
      %49 = vector.broadcast %cst_42 : f32 to vector<32x1xf32>
      %50 = arith.addf %49, %48 : vector<32x1xf32>
      %51 = arith.divf %49, %50 : vector<32x1xf32>
      %52 = arith.addf %35, %51 : vector<32x1xf32>
      %53 = vector.shape_cast %52 : vector<32x1xf32> to vector<1x32x1xf32>
      %c0_43 = arith.constant 0 : index
      %c0_44 = arith.constant 0 : index
      %c0_45 = arith.constant 0 : index
      %54 = vector.load %arg7[%c0_43, %c0_44, %c0_45] : memref<1x32x1xf32, #tpu.memory_space<vmem>>, vector<1x32x1xf32>
      tpu.vector_store %arg7[%c0_43, %c0_44, %c0_45], %53 {strides = array<i32>} : memref<1x32x1xf32, #tpu.memory_space<vmem>>, vector<1x32x1xf32>,
    } else {
    }
    return
  }
  func.func @transform_0(%arg0: i32, %arg1: i32) -> (i32, i32, i32) {
    %c0_i32 = arith.constant 0 : i32
    %c0_i32_0 = arith.constant 0 : i32
    return %arg0, %c0_i32, %arg1 : i32, i32, i32
  }
  func.func @transform_1(%arg0: i32, %arg1: i32) -> (i32, i32) {
    %c0_i32 = arith.constant 0 : i32
    %c0_i32_0 = arith.constant 0 : i32
    %c0_i32_1 = arith.constant 0 : i32
    return %c0_i32, %c0_i32_0 : i32, i32
  }
  func.func @transform_2(%arg0: i32, %arg1: i32) -> (i32, i32) {
    %c0_i32 = arith.constant 0 : i32
    %c0_i32_0 = arith.constant 0 : i32
    %c0_i32_1 = arith.constant 0 : i32
    return %c0_i32, %c0_i32_0 : i32, i32
  }
  func.func @transform_3(%arg0: i32, %arg1: i32) -> (i32, i32) {
    %c0_i32 = arith.constant 0 : i32
    %c0_i32_0 = arith.constant 0 : i32
    %c0_i32_1 = arith.constant 0 : i32
    return %c0_i32, %c0_i32_0 : i32, i32
  }
  func.func @transform_4(%arg0: i32, %arg1: i32) -> (i32, i32) {
    %c0_i32 = arith.constant 0 : i32
    %c0_i32_0 = arith.constant 0 : i32
    %c0_i32_1 = arith.constant 0 : i32
    return %c0_i32, %c0_i32_0 : i32, i32
  }
  func.func @transform_5(%arg0: i32, %arg1: i32) -> (i32, i32, i32) {
    %c0_i32 = arith.constant 0 : i32
    %c0_i32_0 = arith.constant 0 : i32
    %c0_i32_1 = arith.constant 0 : i32
    return %arg0, %c0_i32, %c0_i32_0 : i32, i32, i32
  }
}

</mosaic_0001>

<bundles_post_ra>
// kernel: tpu_custom_call.1
= control target key start
LH: loop header
LB: loop body
LE: loop exit
PB: predicated region body
PF: predicated region fallthrough
CT: control target
= control target key end

     0   :  { %10 = vsyncpa [#allocation5], 0  ;;  %s1211_s0 = inlined_call_operand.hbm [shape: f32[2,32,256], index: 0, kind: input, shape index: {}]   ;;  %s1212_s1 = inlined_call_operand.vmem [shape: f32[2,32], index: 1, kind: input, shape index: {}]   ;;  %s1213_s2 = inlined_call_operand.vmem [shape: f32[2,1], index: 2, kind: input, shape index: {}]   ;;  %s1214_s3 = inlined_call_operand.vmem [shape: f32[32,2], index: 3, kind: input, shape index: {}]   ;;  %s1215_s4 = inlined_call_operand.vmem [shape: f32[32,1], index: 4, kind: input, shape index: {}]   ;;  %s1216_s5 = inlined_call_operand.vmem [shape: f32[2,32,1], index: 5, kind: output, shape index: {}]  }
   0x1   :  { %12 = vsyncpa [#allocation5 + $0x1], 0  ;;  %s965_s18 = smov 0   ;;  %s967_s19 = smov 0  }
   0x2   :  { %s969_s20 = smov 0   ;;  %s971_s21 = smov 0  }
   0x3   :  { %s973_s22 = smov 0   ;;  %s975_s23 = smov 0  }
   0x4 LB: > { %s721_s24 = sadd.s32 4294967295, %s929_s23   ;;  %s30_s25 = sadd.s32 1, %s925_s22  ;;  %s929_s23 = sphi %s975_s23, %s18_s23   ;;  %s925_s22 = sphi %s973_s22, %s1231_s22   ;;  %s921_s21 = sphi %s971_s21, %s1230_s21   ;;  %s917_s20 = sphi %s969_s20, %s1229_s20   ;;  %s913_s19 = sphi %s967_s19, %s1228_s19   ;;  %s909_s18 = sphi %s965_s18, %s1227_s18  }
   0x5   : > { %p32_p0 = scmp.ge.s32.totalorder %s30_s25, 2  ;;  %s39_s26 = sadd.s32 1, %s917_s20 }
   0x6   : > { %p46_p1 = scmp.ne.s32.totalorder %s917_s20, %s913_s19  ;;  %p47_p2 = scmp.eq.s32.totalorder %s929_s23, 0 }
   0x7   : > { %s1233_s25 = smov (%p32_p0, %s30_s25), 0  ;;  %p52_p4 = scmp.ne.s32.totalorder %s913_s19, %s909_s18 }
   0x8   : > { %p1001_p3 = por %p47_p2, %p46_p1  ;;  %s34_s28 = ssub.s32 %s925_s22, %s1233_s25 }
   0x9   : > { %p53_p5 = scmp.eq.s32.totalorder %s721_s24, 0  ;;  %p37_p6 = scmp.eq.s32.totalorder %s34_s28, 0 }
   0xa   : > { %p764_p8 = scmp.lt.s32.totalorder %s929_s23, 2  ;;  %s198_s6 = sand.u32 1, %s917_s20  }
   0xb   : > { %p1008_p7 = por %p53_p5, %p52_p4  ;;  %s754_s7 = sshll.u32 %s925_s22, 6 }
   0xc   : > { %s1014_s30 = scalar_select %p37_p6, %s917_s20, %s39_s26  }
   0xd   : > { %s725_s8 = sshll.u32 %s198_s6, 6  ;;  %s209_s11 = scalar_lea.hbm %s1211_s0, %s754_s7 }
   0xe   : > { %s210_s12 = sshll.u32 %s209_s11, 4  ;;  %s202_s13 = scalar_lea.vmem [#allocation4], %s725_s8  ;;  %s211_s12 = int_to_ptr.hbm [resolvable:$true] %s210_s12 }
   0xf   : > { %s212_s14 = sshll.u32 %s202_s13, 4  ;;  %p761_p9 = pnand %p764_p8, %p1001_p3  ;;  %s213_s14 = int_to_ptr.vmem [resolvable:$true] %s212_s14 }
  0x10   : > { %p728_p10 = scmp.ge.s32.totalorder %s929_s23, 1  ;;  %p220_p11 = scmp.lt.s32.totalorder %s929_s23, 3 }
  0x11   : > { %s199_s15 = scalar_lea.sflag [#allocation5], %s198_s6  ;;  %s931_s16 = smov 256  }
  0x12   : > { %s932_s17 = smov 16   ;;  %p221_p12 = pnand %p728_p10, %p220_p11 }
  0x13   : > { %763 = dma.hbm_to_vmem [thread:$0]  (!%p761_p9), %s211_s12, 1024, %s213_s14, %s199_s15, %s931_s16, %s931_s16, %s932_s17  }
  0x14   : > { %224 = sbr.rel (%p221_p12) target bundleno = 491 (0x1eb), region = 40  ;;  %s226_s18 = sand.u32 (!%p221_p12), 1, %s913_s19  }
  0x15   : > { %s729_s24 = sshll.u32 (!%p221_p12), %s226_s18, 6  ;;  %s227_s26 = scalar_lea.sflag (!%p221_p12), [#allocation5], %s226_s18 }
  0x16   : > { %s230_s28 = scalar_lea.vmem (!%p221_p12), [#allocation4], %s729_s24 }
  0x19   : > { %904 = dma.done.wait (%p1008_p7), %s227_s26, 1024  }
  0x1a   : > { %906 = vsyncadd (%p1008_p7), %s227_s26, 4294966272  ;;  %vm268_vm0 = vcmask 7168   ;;  %v933_v0 = vmov -inf   ;;  %v283_v1 = vld [vmem:[%s230_s28 + $0x30] sm:$0xff]  ;;  %v284_v2 = vld [vmem:[%s230_s28 + $0x38] sm:$0xff]  ;;  %v934_v17 = vmov 0.0  }
  0x1b   : > { %276 = vst.msk [vmem:[#allocation3 + $0x18] sm:$0xff] %vm268_vm0, %v933_v0  ;;  %v279_v3 = vld [vmem:[%s230_s28 + $0x10] sm:$0xff]  ;;  %v323_v4 = vmax.f32 %v283_v1, %v284_v2  ;;  %v280_v5 = vld [vmem:[%s230_s28 + $0x18] sm:$0xff]  ;;  %v294_v6 = vadd.f32 %v284_v2, %v283_v1  ;;  %v281_v8 = vld [vmem:[%s230_s28 + $0x20] sm:$0xff]  ;;  %vm347_vm1 = vcmask 261120   ;;  %vm393_vm2 = vcmask 1041408  }
  0x1c   : > { %273 = vst.msk [vmem:[#allocation3] sm:$0xff] %vm268_vm0, %v933_v0  ;;  %v317_v7 = vmax.f32 %v279_v3, %v280_v5  ;;  %v282_v9 = vld [vmem:[%s230_s28 + $0x28] sm:$0xff]  ;;  %v277_v10 = vld [vmem:[%s230_s28] sm:$0xff]  ;;  %v288_v15 = vadd.f32 %v280_v5, %v279_v3  ;;  %vm380_vm3 = vcmask 15360   ;;  %v375_v1 = vld [vmem:[%s1214_s3 + $0x18] sm:$0xff]  ;;  %p259_p13 = scmp.lt.s32.totalorder %s921_s21, 1 }
  0x1d   : > { %274 = vst.msk [vmem:[#allocation3 + $0x8] sm:$0xff] %vm268_vm0, %v933_v0  ;;  %324 = vmax.xlane.f32.xlu0 %v323_v4  ;;  %295 = vadd.xlane.f32.xlu2 %v294_v6  ;;  %v278_v11 = vld [vmem:[%s230_s28 + $0x8] sm:$0xff]  ;;  %v320_v12 = vmax.f32 %v281_v8, %v282_v9  ;;  %v291_v13 = vadd.f32 %v282_v9, %v281_v8  ;;  %v345_v49 = vld [vmem:[%s1212_s1] sm:$0x3] }
  0x1e   : > { %275 = vst.msk [vmem:[#allocation3 + $0x10] sm:$0xff] %vm268_vm0, %v933_v0  ;;  %318 = vmax.xlane.f32.xlu1 %v317_v7  ;;  %v314_v14 = vmax.f32 %v277_v10, %v278_v11  ;;  %v285_v16 = vadd.f32 %v278_v11, %v277_v10  ;;  %v346_v55 = vld [vmem:[%s1213_s2] sm:$0x3]  ;;  %v373_v61 = vld [vmem:[%s1214_s3 + $0x8] sm:$0xff]  ;;  %v374_v0 = vld [vmem:[%s1214_s3 + $0x10] sm:$0xff]  ;;  %s1235_s21 = smov (!%p259_p13, %s921_s21), 1 }
  0x1f   : > { %272 = vst.msk [vmem:[#allocation2 + $0x18] sm:$0xff] %vm268_vm0, %v934_v17  ;;  %v372_v62 = vld [vmem:[%s1214_s3] sm:$0xff]  ;;  %v377_v2 = vld [vmem:[%s1215_s4 + $0x8] sm:$0xff]  ;;  %s755_s6 = sshll.u32 %s1235_s21, 5 }
  0x20   : > { %269 = vst.msk [vmem:[#allocation2] sm:$0xff] %vm268_vm0, %v934_v17  ;;  %v376_v3 = vld [vmem:[%s1215_s4] sm:$0xff]  ;;  %s1170_s8 = scalar_lea.vmem %s1216_s5, %s755_s6 }
  0x21   : > { %270 = vst.msk [vmem:[#allocation2 + $0x8] sm:$0xff] %vm268_vm0, %v934_v17 }
  0x22   : > { %271 = vst.msk [vmem:[#allocation2 + $0x10] sm:$0xff] %vm268_vm0, %v934_v17  ;;  %v313_v18 = vld [vmem:[#allocation3 + $0x18] sm:$0xff] }
  0x23   : > { %v310_v29 = vld [vmem:[#allocation3] sm:$0xff] }
  0x24   : > { %v311_v20 = vld [vmem:[#allocation3 + $0x8] sm:$0xff] }
  0x25   : > { %321 = vmax.xlane.f32.xlu0 %v320_v12  ;;  %292 = vadd.xlane.f32.xlu2 %v291_v13  ;;  %v312_v27 = vld [vmem:[#allocation3 + $0x10] sm:$0xff] }
  0x26   : > { %315 = vmax.xlane.f32.xlu1 %v314_v14  ;;  %v300_v19 = vld [vmem:[#allocation2 + $0x18] sm:$0xff]  ;;  %v378_v14 = vld [vmem:[%s1215_s4 + $0x10] sm:$0xff] }
  0x27   : > { %v297_v40 = vld [vmem:[#allocation2] sm:$0xff] }
  0x28   : > { %v298_v39 = vld [vmem:[#allocation2 + $0x8] sm:$0xff] }
  0x29   : > { %v299_v28 = vld [vmem:[#allocation2 + $0x10] sm:$0xff] }
  0x2d   : > { %289 = vadd.xlane.f32.xlu0 %v288_v15 }
  0x2e   : > { %286 = vadd.xlane.f32.xlu1 %v285_v16 }
  0x90   : > { %v325_v21 = vpop.xlane.xlu0 %324  ;;  %v296_v22 = vpop.xlane.xlu2 %295 }
  0x91   : > { %v329_v23 = vmax.f32 %v313_v18, %v325_v21  ;;  %v319_v24 = vpop.xlane.xlu1 %318  ;;  %v304_v25 = vadd.f32 %v300_v19, %v296_v22 }
  0x92   : > { %v327_v26 = vmax.f32 %v311_v20, %v319_v24 }
  0x93   : > { %333 = vst.msk [vmem:[#allocation3 + $0x18] sm:$0xff] %vm268_vm0, %v329_v23 }
  0x94   : > { %331 = vst.msk [vmem:[#allocation3 + $0x8] sm:$0xff] %vm268_vm0, %v327_v26 }
  0x95   : > { %309 = vst.msk [vmem:[#allocation2 + $0x18] sm:$0xff] %vm268_vm0, %v304_v25 }
  0x98   : > { %v322_v30 = vpop.xlane.xlu0 %321  ;;  %v293_v31 = vpop.xlane.xlu2 %292 }
  0x99   : > { %v328_v32 = vmax.f32 %v312_v27, %v322_v30  ;;  %v316_v33 = vpop.xlane.xlu1 %315  ;;  %v303_v34 = vadd.f32 %v299_v28, %v293_v31  ;;  %v379_v30 = vld [vmem:[%s1215_s4 + $0x18] sm:$0xff] }
  0x9a   : > { %v326_v35 = vmax.f32 %v310_v29, %v316_v33  ;;  %v505_v36 = vld [vmem:[#allocation3 + $0x18] sm:$0xff] }
  0x9b   : > { %332 = vst.msk [vmem:[#allocation3 + $0x10] sm:$0xff] %vm268_vm0, %v328_v32  ;;  %518 = vmatpush.msra.mxu2 %v505_v36  ;;  %v503_v46 = vld [vmem:[#allocation3 + $0x8] sm:$0xff] }
  0x9c   : > { %330 = vst.msk [vmem:[#allocation3] sm:$0xff] %vm268_vm0, %v326_v35  ;;  %v340_v37 = vld [vmem:[#allocation2 + $0x18] sm:$0xff] }
  0x9d   : > { %308 = vst.msk [vmem:[#allocation2 + $0x10] sm:$0xff] %vm268_vm0, %v303_v34  ;;  %v344_v38 = vmul.f32 0.00390625, %v340_v37 }
  0x9f   : > { %363 = vmatpush.msra.mxu0 %v344_v38 }
  0xa0   : > { %v290_v41 = vpop.xlane.xlu0 %289 }
  0xa1   : > { %v302_v42 = vadd.f32 %v298_v39, %v290_v41  ;;  %v287_v43 = vpop.xlane.xlu1 %286 }
  0xa2   : > { %v301_v44 = vadd.f32 %v297_v40, %v287_v43  ;;  %v504_v45 = vld [vmem:[#allocation3 + $0x10] sm:$0xff] }
  0xa3   : > { %307 = vst.msk [vmem:[#allocation2 + $0x8] sm:$0xff] %vm268_vm0, %v302_v42  ;;  %519 = vmatpush.msra.mxu2 %v504_v45  ;;  %v502_v47 = vld [vmem:[#allocation3] sm:$0xff] }
  0xa4   : > { %306 = vst.msk [vmem:[#allocation2] sm:$0xff] %vm268_vm0, %v301_v44  ;;  %v339_v48 = vld [vmem:[#allocation2 + $0x10] sm:$0xff] }
  0xa5   : > { %520 = vmatpush.msra.mxu2 %v503_v46  ;;  %v343_v50 = vmul.f32 0.00390625, %v339_v48 }
  0xa7   : > { %521 = vmatpush.msra.mxu2 %v502_v47  ;;  %364 = vmatpush.msra.mxu0 %v343_v50 }
  0xa8   : > { %742 = vmatmul.msk.f32.vlgmr.msra.gmra.mxu2 %vm347_vm1, %v345_v49 }
  0xaa   : > { %v338_v51 = vld [vmem:[#allocation2 + $0x8] sm:$0xff] }
  0xab   : > { %v342_v52 = vmul.f32 0.00390625, %v338_v51  ;;  %v337_v53 = vld [vmem:[#allocation2] sm:$0xff] }
  0xac   : > { %v341_v54 = vmul.f32 0.00390625, %v337_v53 }
  0xad   : > { %365 = vmatpush.msra.mxu0 %v342_v52 }
  0xaf   : > { %366 = vmatpush.msra.mxu0 %v341_v54 }
  0xb0   : > { %732 = vmatmul.msk.f32.vlgmr.msra.gmra.mxu0 %vm347_vm1, %v345_v49 }
 0x12b   : > { %v523_v56 = vpop.f32.mrf.mxu2 }
 0x12c   : > { %v524_v57 = vadd.f32 %v523_v56, %v346_v55 }
 0x12d   : > { %v368_v58 = vpop.f32.mrf.mxu0 }
 0x12e   : > { %v526_v59 = vmax.f32 %v524_v57, 0.0  ;;  %v369_v60 = vadd.f32 %v368_v58, %v346_v55 }
 0x130   : > { %v371_v63 = vmax.f32 %v369_v60, 0.0  ;;  %743 = vmatpush.msk.msrb.mxu2 %vm393_vm2, %v526_v59  ;;  %757 = vmatpush.msk.msra.mxu3 %vm393_vm2, %v526_v59 }
 0x131   : > { %745 = vmatmul.msk.f32.vlgmr.msra.gmra.mxu3 %vm380_vm3, %v373_v61  ;;  %744 = vmatmul.msk.f32.vlgmr.msrb.gmra.mxu2 %vm380_vm3, %v372_v62 }
 0x132   : > { %756 = vmatpush.msk.msra.mxu1 %vm393_vm2, %v371_v63  ;;  %733 = vmatpush.msk.msrb.mxu0 %vm393_vm2, %v371_v63 }
 0x133   : > { %735 = vmatmul.msk.f32.vlgmr.msra.gmra.mxu1 %vm380_vm3, %v373_v61  ;;  %734 = vmatmul.msk.f32.vlgmr.msrb.gmra.mxu0 %vm380_vm3, %v372_v62 }
 0x139   : > { %746 = vmatmul.msk.f32.gmra.mxu3 %vm380_vm3, %v374_v0 }
 0x13b   : > { %736 = vmatmul.msk.f32.gmra.mxu1 %vm380_vm3, %v374_v0 }
 0x141   : > { %747 = vmatmul.msk.f32.gmra.mxu3 %vm380_vm3, %v375_v1 }
 0x143   : > { %737 = vmatmul.msk.f32.gmra.mxu1 %vm380_vm3, %v375_v1 }
 0x1b0   : > { %v417_v4 = vpop.f32.mrf.mxu1  ;;  %v414_v5 = vpop.f32.mrf.mxu0 }
 0x1b1   : > { %v418_v6 = vadd.f32 %v417_v4, %v377_v2  ;;  %v415_v7 = vadd.f32 %v414_v5, %v376_v3 }
 0x1b3   : > { %v739_v8 = vmul.f32 -1.442695, %v418_v6  ;;  %v738_v9 = vmul.f32 -1.442695, %v415_v7 }
 0x1b4   : > { %v550_v10 = vpop.f32.mrf.mxu3  ;;  %v547_v11 = vpop.f32.mrf.mxu2 }
 0x1b5   : > { %817 = vpow2.f32 %v739_v8  ;;  %v551_v12 = vadd.f32 %v550_v10, %v377_v2  ;;  %v548_v13 = vadd.f32 %v547_v11, %v376_v3 }
 0x1b6   : > { %819 = vpow2.f32 %v738_v9 }
 0x1b7   : > { %v749_v15 = vmul.f32 -1.442695, %v551_v12  ;;  %v748_v16 = vmul.f32 -1.442695, %v548_v13 }
 0x1b8   : > { %v420_v17 = vpop.f32.mrf.mxu1 }
 0x1b9   : > { %821 = vpow2.f32 %v749_v15  ;;  %v421_v18 = vadd.f32 %v420_v17, %v378_v14 }
 0x1ba   : > { %823 = vpow2.f32 %v748_v16 }
 0x1bb   : > { %v818_v19 = vpop.eup %817  ;;  %v740_v20 = vmul.f32 -1.442695, %v421_v18 }
 0x1bc   : > { %v820_v21 = vpop.eup %819  ;;  %v1081_v22 = vadd.f32 1.0, %v818_v19  ;;  %v553_v23 = vpop.f32.mrf.mxu3 }
 0x1bd   : > { %v438_v24 = vadd.f32 1.0, %v820_v21  ;;  %825 = vpow2.f32 %v740_v20  ;;  %v554_v25 = vadd.f32 %v553_v23, %v378_v14 }
 0x1be   : > { %827 = vrcp.f32 %v1081_v22  ;;  %v468_v33 = vand.u32 2147483648, %v1081_v22  ;;  %vm462_vm4 = vweird.f32 %v1081_v22  ;;  %v466_v42 = vand.u32 2147483647, %v1081_v22 }
 0x1bf   : > { %v822_v26 = vpop.eup %821  ;;  %829 = vrcp.f32 %v438_v24  ;;  %v750_v29 = vmul.f32 -1.442695, %v554_v25  ;;  %v451_v35 = vand.u32 2147483647, %v438_v24  ;;  %v453_v36 = vand.u32 2147483648, %v438_v24 }
 0x1c0   : > { %v824_v27 = vpop.eup %823  ;;  %v1084_v28 = vadd.f32 1.0, %v822_v26  ;;  %v423_v31 = vpop.f32.mrf.mxu1  ;;  %v469_v44 = vor.u32 1.1754944e-38, %v468_v33  ;;  %vm447_vm5 = vweird.f32 %v438_v24  ;;  %vm467_vm3 = vcmp.eq.f32.partialorder %v466_v42, 8.507059e+37 }
 0x1c1   : > { %v1089_v32 = vadd.f32 1.0, %v824_v27  ;;  %v424_v37 = vadd.f32 %v423_v31, %v379_v30  ;;  %vm1107_vm6 = vcmp.eq.f32.partialorder %v451_v35, 8.507059e+37  ;;  %v454_v48 = vor.u32 1.1754944e-38, %v453_v36 }
 0x1c2   : > { %831 = vrcp.f32 %v1084_v28  ;;  %v601_v51 = vand.u32 2147483648, %v1084_v28  ;;  %v599_v7 = vand.u32 2147483647, %v1084_v28  ;;  %vm595_vm14 = vweird.f32 %v1084_v28 }
 0x1c3   : > { %v826_v34 = vpop.eup %825  ;;  %833 = vrcp.f32 %v1089_v32  ;;  %v741_v49 = vmul.f32 -1.442695, %v424_v37  ;;  %vm580_vm8 = vweird.f32 %v1089_v32  ;;  %v584_v57 = vand.u32 2147483647, %v1089_v32 }
 0x1c4   : > { %v1094_v38 = vpop.eup %827  ;;  %v1096_v39 = vadd.f32 1.0, %v826_v34  ;;  %835 = vpow2.f32 %v750_v29  ;;  %v556_v43 = vpop.f32.mrf.mxu3  ;;  %v586_v61 = vand.u32 2147483648, %v1089_v32  ;;  %v602_v17 = vor.u32 1.1754944e-38, %v601_v51 }
 0x1c5   : > { %v1098_v40 = vpop.eup %829  ;;  %v458_v41 = vmul.f32 %v1094_v38, %v1081_v22  ;;  %v557_v53 = vadd.f32 %v556_v43, %v379_v30  ;;  %vm463_vm9 = vweird.f32 %v1094_v38  ;;  %vm585_vm2 = vcmp.eq.f32.partialorder %v584_v57, 8.507059e+37 }
 0x1c6   : > { %v443_v45 = vmul.f32 %v1098_v40, %v438_v24  ;;  %837 = vrcp.f32 %v1096_v39  ;;  %vm448_vm7 = vweird.f32 %v1098_v40  ;;  %vm1146_vm13 = vmor %vm462_vm4, %vm463_vm9  ;;  %v587_v15 = vor.u32 1.1754944e-38, %v586_v61 }
 0x1c7   : > { %v459_v46 = vsub.f32 1.0, %v458_v41  ;;  %vm1130_vm10 = vmor %vm447_vm5, %vm448_vm7  ;;  %839 = vpow2.f32 %v741_v49  ;;  %v751_v5 = vmul.f32 -1.442695, %v557_v53  ;;  %vm600_vm4 = vcmp.eq.f32.partialorder %v599_v7, 8.507059e+37 }
 0x1c8   : > { %v832_v50 = vpop.eup %831  ;;  %v444_v52 = vsub.f32 1.0, %v443_v45  ;;  %v481_v36 = vand.u32 2147483647, %v1096_v39  ;;  %v483_v37 = vand.u32 2147483648, %v1096_v39 }
 0x1c9   : > { %v834_v54 = vpop.eup %833  ;;  %v460_v55 = vmul.f32 %v1094_v38, %v459_v46  ;;  %v591_v56 = vmul.f32 %v832_v50, %v1084_v28  ;;  %vm596_vm12 = vweird.f32 %v832_v50 }
 0x1ca   : > { %v836_v58 = vpop.eup %835  ;;  %v445_v59 = vmul.f32 %v1098_v40, %v444_v52  ;;  %v576_v60 = vmul.f32 %v834_v54, %v1089_v32  ;;  %vm581_vm11 = vweird.f32 %v834_v54  ;;  %vm597_vm1 = vmor %vm595_vm14, %vm596_vm12  ;;  %v484_v45 = vor.u32 1.1754944e-38, %v483_v37 }
 0x1cb   : > { %v461_v62 = vadd.f32 %v1094_v38, %v460_v55  ;;  %v592_v63 = vsub.f32 1.0, %v591_v56  ;;  %v1134_v1 = vadd.f32 1.0, %v836_v58  ;;  %vm1161_vm15 = vmor %vm580_vm8, %vm581_vm11  ;;  %vm482_vm11 = vcmp.eq.f32.partialorder %v481_v36, 8.507059e+37 }
 0x1cc   : > { %v1136_v2 = vpop.eup %837  ;;  %v446_v3 = vadd.f32 %v1098_v40, %v445_v59  ;;  %v577_v4 = vsub.f32 1.0, %v576_v60 }
 0x1cd   : > { %v593_v6 = vmul.f32 %v832_v50, %v592_v63  ;;  %v473_v8 = vmul.f32 %v1136_v2, %v1096_v39  ;;  %841 = vrcp.f32 %v1134_v1  ;;  %v465_v12 = vsel %vm1146_vm13, %v1094_v38, %v461_v62  ;;  %v840_v19 = vpop.eup %839 }
 0x1ce   : > { %v450_v10 = vsel %vm1130_vm10, %v1098_v40, %v446_v3  ;;  %v578_v11 = vmul.f32 %v834_v54, %v577_v4  ;;  %843 = vpow2.f32 %v751_v5  ;;  %v470_v22 = vsel %vm467_vm3, %v469_v44, %v465_v12 }
 0x1cf   : > { %v594_v13 = vadd.f32 %v832_v50, %v593_v6  ;;  %v474_v16 = vsub.f32 1.0, %v473_v8  ;;  %v455_v21 = vsel %vm1107_vm6, %v454_v48, %v450_v10  ;;  %v441_v28 = vadd.f32 1.0, %v840_v19 }
 0x1d0   : > { %v579_v18 = vadd.f32 %v834_v54, %v578_v11  ;;  %vm478_vm5 = vweird.f32 %v1136_v2  ;;  %vm477_vm6 = vweird.f32 %v1096_v39  ;;  %v616_v38 = vand.u32 2147483648, %v1134_v1 }
 0x1d1   : > { %v598_v20 = vsel %vm597_vm1, %v832_v50, %v594_v13  ;;  %v475_v27 = vmul.f32 %v1136_v2, %v474_v16  ;;  %845 = vrcp.f32 %v441_v28  ;;  %v614_v41 = vand.u32 2147483647, %v1134_v1  ;;  %vm479_vm8 = vmor %vm477_vm6, %vm478_vm5 }
 0x1d2   : > { %v603_v23 = vsel %vm600_vm4, %v602_v17, %v598_v20  ;;  %v583_v24 = vsel %vm1161_vm15, %v834_v54, %v579_v18  ;;  %vm610_vm9 = vweird.f32 %v1134_v1  ;;  %v617_v46 = vor.u32 1.1754944e-38, %v616_v38 }
 0x1d3   : > { %v636_v25 = vadd.f32 %v603_v23, %v470_v22  ;;  %v588_v26 = vsel %vm585_vm2, %v587_v15, %v583_v24  ;;  %v842_v29 = vpop.eup %841  ;;  %v476_v33 = vadd.f32 %v1136_v2, %v475_v27  ;;  %vm615_vm12 = vcmp.eq.f32.partialorder %v614_v41, 8.507059e+37 }
 0x1d4   : > { %v635_v30 = vadd.f32 %v588_v26, %v455_v21  ;;  %v606_v31 = vmul.f32 %v842_v29, %v1134_v1  ;;  %v844_v32 = vpop.eup %843  ;;  %vm611_vm7 = vweird.f32 %v842_v29  ;;  %vm492_vm14 = vweird.f32 %v441_v28 }
 0x1d5   : > { %640 = vst.msk [vmem:[%s1170_s8 + $0x8] sm:$0xff] %vm268_vm0, %v636_v25  ;;  %v574_v35 = vadd.f32 1.0, %v844_v32  ;;  %v480_v43 = vsel %vm479_vm8, %v1136_v2, %v476_v33  ;;  %vm612_vm10 = vmor %vm610_vm9, %vm611_vm7  ;;  %v498_v57 = vand.u32 2147483648, %v441_v28  ;;  %v496_v59 = vand.u32 2147483647, %v441_v28 }
 0x1d6   : > { %639 = vst.msk [vmem:[%s1170_s8] sm:$0xff] %vm268_vm0, %v635_v30  ;;  %v607_v34 = vsub.f32 1.0, %v606_v31  ;;  %v485_v48 = vsel %vm482_vm11, %v484_v45, %v480_v43 }
 0x1d7   : > { %847 = vrcp.f32 %v574_v35  ;;  %v846_v42 = vpop.eup %845  ;;  %v631_v58 = vand.u32 2147483648, %v574_v35  ;;  %v629_v61 = vand.u32 2147483647, %v574_v35  ;;  %vm625_vm2 = vweird.f32 %v574_v35 }
 0x1d8   : > { %v608_v40 = vmul.f32 %v842_v29, %v607_v34  ;;  %v488_v47 = vmul.f32 %v846_v42, %v441_v28  ;;  %vm493_vm13 = vweird.f32 %v846_v42  ;;  %v499_v0 = vor.u32 1.1754944e-38, %v498_v57 }
 0x1d9   : > { %vm494_vm1 = vmor %vm492_vm14, %vm493_vm13  ;;  %v632_v1 = vor.u32 1.1754944e-38, %v631_v58  ;;  %vm497_vm4 = vcmp.eq.f32.partialorder %v496_v59, 8.507059e+37  ;;  %vm630_vm5 = vcmp.eq.f32.partialorder %v629_v61, 8.507059e+37 }
 0x1da   : > { %v609_v44 = vadd.f32 %v842_v29, %v608_v40  ;;  %v489_v50 = vsub.f32 1.0, %v488_v47 }
 0x1dc   : > { %v613_v39 = vsel %vm612_vm10, %v842_v29, %v609_v44  ;;  %v490_v53 = vmul.f32 %v846_v42, %v489_v50 }
 0x1dd   : > { %v618_v49 = vsel %vm615_vm12, %v617_v46, %v613_v39  ;;  %v848_v51 = vpop.eup %847 }
 0x1de   : > { %v637_v52 = vadd.f32 %v618_v49, %v485_v48  ;;  %v621_v54 = vmul.f32 %v848_v51, %v574_v35  ;;  %v491_v55 = vadd.f32 %v846_v42, %v490_v53  ;;  %vm626_vm15 = vweird.f32 %v848_v51 }
 0x1df   : > { %vm627_vm3 = vmor %vm625_vm2, %vm626_vm15 }
 0x1e0   : > { %641 = vst.msk [vmem:[%s1170_s8 + $0x10] sm:$0xff] %vm268_vm0, %v637_v52  ;;  %v622_v56 = vsub.f32 1.0, %v621_v54  ;;  %v495_v62 = vsel %vm494_vm1, %v846_v42, %v491_v55 }
 0x1e1   : > { %v500_v3 = vsel %vm497_vm4, %v499_v0, %v495_v62 }
 0x1e2   : > { %v623_v60 = vmul.f32 %v848_v51, %v622_v56 }
 0x1e4   : > { %v624_v63 = vadd.f32 %v848_v51, %v623_v60 }
 0x1e6   : > { %v628_v2 = vsel %vm627_vm3, %v848_v51, %v624_v63 }
 0x1e7   : > { %v633_v4 = vsel %vm630_vm5, %v632_v1, %v628_v2 }
 0x1e8   : > { %v638_v5 = vadd.f32 %v633_v4, %v500_v3 }
 0x1ea   : > { %642 = vst.msk [vmem:[%s1170_s8 + $0x18] sm:$0xff] %vm268_vm0, %v638_v5 }
 0x1eb PF: > { %s18_s23 = sadd.s32 1, %s929_s23   ;;  %s1227_s18 = smov %s913_s19 }
 0x1ec   : > { %p15_p0 = scmp.ge.s32.totalorder %s18_s23, 4   ;;  %s1228_s19 = smov %s917_s20 }
 0x1ed   : > { %s1229_s20 = smov %s1014_s30  ;;  %s1230_s21 = smov %s925_s22 }
 0x1ee   : > { %s1231_s22 = smov %s1233_s25  ;;  %17 = sbr.rel (!%p15_p0) target bundleno = 4 (0x4), region = 88 }
 0x1f3   :  { %664 = vsyncpa [#allocation5], 1 }
 0x1f4   :  { %666 = vsyncpa [#allocation5 + $0x1], 1 }

</bundles_post_ra>
